<compile_context>
chip_gen: v7x
topology: tpu7x:2x2x1
jax: 0.10.0
libtpu: 0.0.40
codegen_flags: <defaults>
</compile_context>

<pallas_src>
import functools

import jax
import jax.numpy as jnp
from jax.experimental import pallas as pl
from jax.experimental.pallas import tpu as pltpu


def _pwconv_bn_kernel(x_ref, w_ref, shift_ref, o_ref, *, c_in, use_vpu):
    # x_ref:     (1, C_in, ts)  input tile (lane axis = spatial)
    # w_ref:     (tn, C_in)     BN-scale-folded weights
    # shift_ref: (tn, 1)        folded conv-bias + BN shift
    # o_ref:     (1, tn, ts)
    x = x_ref[0]          # (C_in, ts)
    w = w_ref[...]        # (tn, C_in)
    if use_vpu:
        # Tiny-K path: unrolled broadcast multiply-add on the VPU; skips the
        # MXU push/pop for K<=8 and keeps the kernel load/store + VALU bound.
        xf = x.astype(jnp.float32)
        wf = w.astype(jnp.float32)
        acc = wf[:, 0:1] * xf[0:1, :]
        for c in range(1, c_in):
            acc = acc + wf[:, c:c + 1] * xf[c:c + 1, :]
    else:
        acc = jnp.dot(w, x, preferred_element_type=jnp.float32)
    o_ref[0] = (acc + shift_ref[...]).astype(o_ref.dtype)


def _pick_tiles(hw, c_in, c_out, itemsize):
    # C_out tile: only tile when large (keeps weight/output blocks bounded on
    # v7x's smaller VMEM); small C_out stays un-tiled (full-dim block).
    if c_out <= 512:
        tn = c_out
    else:
        tn = next((t for t in (512, 256, 128) if c_out % t == 0), c_out)

    # Spatial tile: as big as a ~16 MiB double-buffered (input + output)
    # budget allows, capped at 2048 lanes, multiple of 128.
    if hw % 128 != 0:
        ts = hw   # full spatial extent as a single block (full-dim allowed)
    else:
        budget = 16 * 1024 * 1024
        cap = budget // (2 * (c_in + tn) * itemsize)
        ts = min(hw, 2048, max(128, (cap // 128) * 128))
    return tn, ts


def pointwise_conv2d_bn(x_nchw, conv_w, conv_b, bn_gamma, bn_beta,
                        bn_mean, bn_var, eps=1e-5, compute_dtype=None):
    """Fused 1x1 Conv2d + eval-mode BatchNorm2d.

    x_nchw: (N, C_in, H, W); conv_w: (C_out, C_in, 1, 1).
    compute_dtype: optionally cast x/weights (e.g. jnp.bfloat16 on v6e/v7x to
    halve HBM traffic); accumulation and the shift stay float32.
    """
    N, C_in, H, W = x_nchw.shape
    C_out = conv_w.shape[0]
    HW = H * W
    out_dtype = x_nchw.dtype

    # Fold conv bias + BN into per-channel scale/shift, then fold the scale
    # directly into the weights so the kernel only performs a single add.
    inv_std = 1.0 / jnp.sqrt(bn_var.astype(jnp.float32) + eps)
    scale = bn_gamma.astype(jnp.float32) * inv_std                        # (C_out,)
    shift = ((conv_b.astype(jnp.float32) - bn_mean.astype(jnp.float32)) * scale
             + bn_beta.astype(jnp.float32)).reshape(C_out, 1)             # (C_out, 1)
    w2d = conv_w.reshape(C_out, C_in).astype(jnp.float32) * scale[:, None]

    # NCHW is already channel-major over a contiguous spatial axis: a reshape
    # (no transpose, no extra HBM pass) gives (N, C_in, H*W).
    x3 = x_nchw.reshape(N, C_in, HW)
    if compute_dtype is not None:
        x3 = x3.astype(compute_dtype)
        w2d = w2d.astype(compute_dtype)

    itemsize = jnp.dtype(x3.dtype).itemsize
    tn, ts = _pick_tiles(HW, C_in, C_out, itemsize)
    grid = (N, pl.cdiv(C_out, tn), pl.cdiv(HW, ts))

    kernel = functools.partial(_pwconv_bn_kernel, c_in=C_in,
                               use_vpu=(C_in <= 8))

    out3 = pl.pallas_call(
        kernel,
        out_shape=jax.ShapeDtypeStruct((N, C_out, HW), out_dtype),
        grid_spec=pltpu.PrefetchScalarGridSpec(
            num_scalar_prefetch=0,
            grid=grid,
            in_specs=[
                pl.BlockSpec((1, C_in, ts), lambda n, co, s: (n, 0, s)),
                pl.BlockSpec((tn, C_in), lambda n, co, s: (co, 0)),
                pl.BlockSpec((tn, 1), lambda n, co, s: (co, 0)),
            ],
            out_specs=pl.BlockSpec((1, tn, ts), lambda n, co, s: (n, co, s)),
        ),
        compiler_params=pltpu.CompilerParams(
            dimension_semantics=("parallel", "parallel", "parallel"),
            vmem_limit_bytes=32 * 1024 * 1024,
        ),
    )(x3, w2d, shift)

    return out3.reshape(N, C_out, H, W)


def reference(x_nchw, conv_w, conv_b, bn_gamma, bn_beta, bn_mean, bn_var,
              eps=1e-5):
    # Pure-JAX reference of Conv2d(k=1) + eval-mode BatchNorm2d.
    y = jnp.einsum("nchw,oc->nohw", x_nchw, conv_w.reshape(conv_w.shape[0], -1))
    y = y + conv_b[None, :, None, None]
    inv_std = 1.0 / jnp.sqrt(bn_var + eps)
    return (y - bn_mean[None, :, None, None]) * (bn_gamma * inv_std)[None, :, None, None] \
        + bn_beta[None, :, None, None]


if __name__ == "__main__":
    key = jax.random.PRNGKey(0)
    k_x, k_w, k_b, k_g, k_bt, k_m, k_v = jax.random.split(key, 7)

    N, C_in, C_out, H, W = 2, 4, 8, 16, 16

    x = jax.random.normal(k_x, (N, C_in, H, W), dtype=jnp.float32)
    conv_w = jax.random.normal(k_w, (C_out, C_in, 1, 1), dtype=jnp.float32) * 0.1
    conv_b = jax.random.normal(k_b, (C_out,), dtype=jnp.float32) * 0.1
    bn_gamma = 1.0 + 0.1 * jax.random.normal(k_g, (C_out,), dtype=jnp.float32)
    bn_beta = 0.1 * jax.random.normal(k_bt, (C_out,), dtype=jnp.float32)
    bn_mean = 0.1 * jax.random.normal(k_m, (C_out,), dtype=jnp.float32)
    bn_var = jnp.abs(1.0 + 0.1 * jax.random.normal(k_v, (C_out,), dtype=jnp.float32))

    out = pointwise_conv2d_bn(x, conv_w, conv_b, bn_gamma, bn_beta,
                              bn_mean, bn_var)
    out = jax.block_until_ready(out)

    ref = reference(x, conv_w, conv_b, bn_gamma, bn_beta, bn_mean, bn_var)
    assert out.shape == (N, C_out, H, W)
    assert jnp.allclose(out, ref, atol=1e-5, rtol=1e-5)

    print("KERNEL_OK")
</pallas_src>

<mosaic_0001>
module attributes {stable_mosaic.version = 11 : i64} {
  func.func @_pwconv_bn_kernel(%arg0: i32, %arg1: i32, %arg2: i32, %arg3: memref<1x4x256xf32, #tpu.memory_space<vmem>>, %arg4: memref<8x4xf32, #tpu.memory_space<vmem>>, %arg5: memref<8x1xf32, #tpu.memory_space<vmem>>, %arg6: memref<1x8x256xf32, #tpu.memory_space<vmem>>) attributes {dimension_semantics = [#tpu.dimension_semantics<parallel>, #tpu.dimension_semantics<parallel>, #tpu.dimension_semantics<parallel>], iteration_bounds = array<i64: 2, 1, 1>, scalar_prefetch = 0 : i64, scratch_operands = 0 : i64, tpu.core_type = #tpu.core_type<tc>, window_params = [{transform_indices = @transform_0, window_bounds = array<i64: 1, 4, 256>}, {transform_indices = @transform_1, window_bounds = array<i64: 8, 4>}, {transform_indices = @transform_2, window_bounds = array<i64: 8, 1>}, {transform_indices = @transform_3, window_bounds = array<i64: 1, 8, 256>}]} {
    %c0 = arith.constant 0 : index
    %c0_0 = arith.constant 0 : index
    %c0_1 = arith.constant 0 : index
    %0 = vector.load %arg3[%c0, %c0_0, %c0_1] : memref<1x4x256xf32, #tpu.memory_space<vmem>>, vector<1x4x256xf32>
    %1 = vector.shape_cast %0 : vector<1x4x256xf32> to vector<4x256xf32>
    %c0_2 = arith.constant 0 : index
    %c0_3 = arith.constant 0 : index
    %2 = vector.load %arg4[%c0_2, %c0_3] : memref<8x4xf32, #tpu.memory_space<vmem>>, vector<8x4xf32>
    %3 = vector.extract_strided_slice %2 {offsets = [0, 0], sizes = [8, 1], strides = [1, 1]} : vector<8x4xf32> to vector<8x1xf32>
    %4 = vector.extract_strided_slice %1 {offsets = [0, 0], sizes = [1, 256], strides = [1, 1]} : vector<4x256xf32> to vector<1x256xf32>
    %5 = vector.broadcast %3 : vector<8x1xf32> to vector<8x256xf32>
    %6 = vector.broadcast %4 : vector<1x256xf32> to vector<8x256xf32>
    %7 = arith.mulf %5, %6 : vector<8x256xf32>
    %8 = vector.extract_strided_slice %2 {offsets = [0, 1], sizes = [8, 1], strides = [1, 1]} : vector<8x4xf32> to vector<8x1xf32>
    %9 = vector.extract_strided_slice %1 {offsets = [1, 0], sizes = [1, 256], strides = [1, 1]} : vector<4x256xf32> to vector<1x256xf32>
    %10 = vector.broadcast %8 : vector<8x1xf32> to vector<8x256xf32>
    %11 = vector.broadcast %9 : vector<1x256xf32> to vector<8x256xf32>
    %12 = arith.mulf %10, %11 : vector<8x256xf32>
    %13 = arith.addf %7, %12 : vector<8x256xf32>
    %14 = vector.extract_strided_slice %2 {offsets = [0, 2], sizes = [8, 1], strides = [1, 1]} : vector<8x4xf32> to vector<8x1xf32>
    %15 = vector.extract_strided_slice %1 {offsets = [2, 0], sizes = [1, 256], strides = [1, 1]} : vector<4x256xf32> to vector<1x256xf32>
    %16 = vector.broadcast %14 : vector<8x1xf32> to vector<8x256xf32>
    %17 = vector.broadcast %15 : vector<1x256xf32> to vector<8x256xf32>
    %18 = arith.mulf %16, %17 : vector<8x256xf32>
    %19 = arith.addf %13, %18 : vector<8x256xf32>
    %20 = vector.extract_strided_slice %2 {offsets = [0, 3], sizes = [8, 1], strides = [1, 1]} : vector<8x4xf32> to vector<8x1xf32>
    %21 = vector.extract_strided_slice %1 {offsets = [3, 0], sizes = [1, 256], strides = [1, 1]} : vector<4x256xf32> to vector<1x256xf32>
    %22 = vector.broadcast %20 : vector<8x1xf32> to vector<8x256xf32>
    %23 = vector.broadcast %21 : vector<1x256xf32> to vector<8x256xf32>
    %24 = arith.mulf %22, %23 : vector<8x256xf32>
    %25 = arith.addf %19, %24 : vector<8x256xf32>
    %c0_4 = arith.constant 0 : index
    %c0_5 = arith.constant 0 : index
    %26 = vector.load %arg5[%c0_4, %c0_5] : memref<8x1xf32, #tpu.memory_space<vmem>>, vector<8x1xf32>
    %27 = vector.broadcast %26 : vector<8x1xf32> to vector<8x256xf32>
    %28 = arith.addf %25, %27 : vector<8x256xf32>
    %c0_6 = arith.constant 0 : index
    %c0_7 = arith.constant 0 : index
    %c0_8 = arith.constant 0 : index
    %29 = vector.load %arg6[%c0_6, %c0_7, %c0_8] : memref<1x8x256xf32, #tpu.memory_space<vmem>>, vector<1x8x256xf32>
    %30 = vector.shape_cast %29 : vector<1x8x256xf32> to vector<8x256xf32>
    %31 = vector.shape_cast %28 : vector<8x256xf32> to vector<1x8x256xf32>
    tpu.vector_store %arg6[%c0_6, %c0_7, %c0_8], %31 {strides = array<i32>} : memref<1x8x256xf32, #tpu.memory_space<vmem>>, vector<1x8x256xf32>,
    return
  }
  func.func @transform_0(%arg0: i32, %arg1: i32, %arg2: i32) -> (i32, i32, i32) {
    %c0_i32 = arith.constant 0 : i32
    %c0_i32_0 = arith.constant 0 : i32
    return %arg0, %c0_i32, %arg2 : i32, i32, i32
  }
  func.func @transform_1(%arg0: i32, %arg1: i32, %arg2: i32) -> (i32, i32) {
    %c0_i32 = arith.constant 0 : i32
    %c0_i32_0 = arith.constant 0 : i32
    return %arg1, %c0_i32 : i32, i32
  }
  func.func @transform_2(%arg0: i32, %arg1: i32, %arg2: i32) -> (i32, i32) {
    %c0_i32 = arith.constant 0 : i32
    %c0_i32_0 = arith.constant 0 : i32
    return %arg1, %c0_i32 : i32, i32
  }
  func.func @transform_3(%arg0: i32, %arg1: i32, %arg2: i32) -> (i32, i32, i32) {
    %c0_i32 = arith.constant 0 : i32
    return %arg0, %arg1, %arg2 : i32, i32, i32
  }
}

</mosaic_0001>

<bundles_post_ra>
// kernel: tpu_custom_call.1
= control target key start
LH: loop header
LB: loop body
LE: loop exit
PB: predicated region body
PF: predicated region fallthrough
CT: control target
= control target key end

     0   :  { %8 = vsyncpa [#allocation3], 0  ;;  %s798_s0 = inlined_call_operand.vmem [shape: f32[2,4,256], index: 0, kind: input, shape index: {}]   ;;  %s799_s1 = inlined_call_operand.vmem [shape: f32[8,4], index: 1, kind: input, shape index: {}]   ;;  %s800_s2 = inlined_call_operand.vmem [shape: f32[8,1], index: 2, kind: input, shape index: {}]   ;;  %s801_s3 = inlined_call_operand.hbm [shape: f32[2,8,256], index: 3, kind: output, shape index: {}]  }
   0x1   :  { %10 = vsyncpa [#allocation3 + $0x1], 0  ;;  %s676_s12 = smov 0   ;;  %s678_s13 = smov 0  }
   0x2   :  { %s680_s14 = smov 0   ;;  %s682_s15 = smov 0  }
   0x3   :  { %s684_s16 = smov 0   ;;  %s686_s17 = smov 0  }
   0x4 LB: > { %s489_s18 = sadd.s32 4294967295, %s649_s17   ;;  %s490_s19 = sadd.s32 4294967294, %s649_s17   ;;  %s649_s17 = sphi %s686_s17, %s16_s17   ;;  %s645_s16 = sphi %s684_s16, %s808_s16   ;;  %s641_s15 = sphi %s682_s15, %s807_s15   ;;  %s637_s14 = sphi %s680_s14, %s806_s14   ;;  %s633_s13 = sphi %s678_s13, %s805_s13   ;;  %s629_s12 = sphi %s676_s12, %s804_s12  }
   0x5   : > { %s35_s20 = sadd.s32 1, %s645_s16  ;;  %s126_s21 = sadd.s32 1, %s637_s14 }
   0x6   : > { %p37_p0 = scmp.ge.s32.totalorder %s35_s20, 2  ;;  %p136_p1 = scmp.ne.s32.totalorder %s637_s14, %s633_s13 }
   0x7   : > { %p137_p2 = scmp.eq.s32.totalorder %s489_s18, 1  ;;  %p142_p3 = scmp.ne.s32.totalorder %s633_s13, %s629_s12 }
   0x8   : > { %s810_s20 = smov (%p37_p0, %s35_s20), 0  ;;  %p143_p5 = scmp.eq.s32.totalorder %s490_s19, 1 }
   0x9   : > { %p716_p4 = por %p137_p2, %p136_p1  ;;  %s119_s23 = ssub.s32 %s645_s16, %s810_s20 }
   0xa   : > { %p495_p6 = scmp.ge.s32.totalorder %s649_s17, 1  ;;  %p124_p7 = scmp.eq.s32.totalorder %s119_s23, 0 }
   0xb   : > { %p723_p8 = por %p143_p5, %p142_p3  ;;  %p188_p9 = scmp.lt.s32.totalorder %s649_s17, 3 }
   0xc   : > { %s729_s25 = scalar_select %p124_p7, %s637_s14, %s126_s21  }
   0xd   : > { %p189_p10 = pnand %p495_p6, %p188_p9 }
   0xe   : > { %v244_v0 = vld [vmem:[%s799_s1] sm:$0xff] (!%p189_p10)  ;;  %v651_v1 = vmov (!%p189_p10), 0   ;;  %v652_v2 = vmov (!%p189_p10), 2   ;;  %v653_v3 = vmov (!%p189_p10), 1   ;;  %v654_v4 = vmov (!%p189_p10), 3   ;;  %p225_p11 = scmp.lt.s32.totalorder (!%p189_p10), %s641_s15, 1 }
   0xf   : > { %192 = sbr.rel (%p189_p10) target bundleno = 173 (0xad), region = 32  ;;  %565 = vset.pattern.permute.xlu0 (!%p189_p10), %v651_v1  ;;  %567 = vset.pattern.permute.xlu1 (!%p189_p10), %v652_v2  ;;  %v349_v5 = vld [vmem:[%s800_s2] sm:$0xff] (!%p189_p10)  ;;  %v251_v6 = vlaneseq (!%p189_p10)  ;;  %s221_s8 = sand.u32 (!%p189_p10), 1, %s633_s13  }
  0x10   : > { %247 = vperm.xlu0 (!%p189_p10), %565, %v244_v0   ;;  %298 = vperm.xlu1 (!%p189_p10), %567, %v244_v0   ;;  %s496_s9 = sshll.u32 (!%p189_p10), %s221_s8, 4  ;;  %s505_s10 = sshll.u32 (!%p189_p10), %s641_s15, 8 }
  0x11   : > { %v252_v7 = vshrl.u32 (!%p189_p10), %v251_v6, 7  ;;  %s223_s11 = scalar_lea.vmem (!%p189_p10), [#allocation2], %s496_s9  ;;  %s749_s23 = scalar_lea.hbm (!%p189_p10), %s801_s3, %s505_s10 }
  0x12   : > { %s378_s18 = sshll.u32 (!%p189_p10), %s223_s11, 4  ;;  %s655_s27 = smov (!%p189_p10), [#allocation2]   ;;  %s751_s18 = int_to_ptr.vmem [resolvable:$true] %s378_s18 }
  0x13   : > { %v253_v8 = vsub.s32 (!%p189_p10), 0, %v252_v7  ;;  %v257_v9 = vsub.s32 (!%p189_p10), 4, %v252_v7  ;;  %v277_v10 = vsub.s32 (!%p189_p10), 1, %v252_v7  ;;  %v281_v11 = vsub.s32 (!%p189_p10), 5, %v252_v7  ;;  %s571_s26 = scalar_lea.vmem (!%p189_p10), %s751_s18, 256  ;;  %s575_s28 = sshll.u32 (!%p189_p10), %s655_s27, 4  ;;  %s576_s28 = int_to_ptr.vmem [resolvable:$false] %s575_s28 }
  0x14   : > { %566 = vset.pattern.permute.xlu0 (!%p189_p10), %v653_v3  ;;  %568 = vset.pattern.permute.xlu1 (!%p189_p10), %v654_v4  ;;  %v303_v13 = vsub.s32 (!%p189_p10), 2, %v252_v7  ;;  %v307_v14 = vsub.s32 (!%p189_p10), 6, %v252_v7  ;;  %v329_v15 = vsub.s32 (!%p189_p10), 3, %v252_v7  ;;  %v333_v16 = vsub.s32 (!%p189_p10), 7, %v252_v7  ;;  %p572_p12 = scmp.ne.s32.totalorder (!%p189_p10), %s751_s18, %s571_s26  ;;  %s577_s29 = scalar_lea.vmem (!%p189_p10), %s576_s28, 512 }
  0x15   : > { %272 = vperm.xlu0 (!%p189_p10), %566, %v244_v0   ;;  %324 = vperm.xlu1 (!%p189_p10), %568, %v244_v0   ;;  %p578_p1 = scmp.lt.s32.totalorder (!%p189_p10), %s751_s18, %s576_s28  ;;  %p579_p2 = scmp.lt.s32.totalorder (!%p189_p10), %s577_s29, %s571_s26 }
  0x16   : > { %s226_s30 = scalar_select %p225_p11, %s641_s15, 1 }
  0x17   : > { %s360_s15 = scalar_lea.sflag [#allocation3], %s221_s8  ;;  %p573_p13 = pnand %p572_p12, %p716_p4 }
  0x18   : > { %s504_s4 = sshll.u32 %s226_s30, 3  ;;  %p580_p3 = por %p579_p2, %p578_p1 }
  0x19   : > { %569 = vset.pattern.permute.xlu1 %v651_v1  ;;  %570 = vset.pattern.permute.xlu0 %v651_v1  ;;  %s232_s7 = scalar_lea.vmem %s798_s0, %s504_s4  ;;  %p574_p0 = pneg %p573_p13 }
  0x1a   : > { %352 = vperm.xlu1 %569, %v349_v5   ;;  %v243_v12 = vld [vmem:[%s232_s7] sm:$0xff] }
  0x1b   : > { %v254_v17 = vrot.slane %v243_v12, %v253_v8  ;;  %v258_v18 = vrot.slane %v243_v12, %v257_v9  ;;  %v278_v19 = vrot.slane %v243_v12, %v277_v10  ;;  %v282_v20 = vrot.slane %v243_v12, %v281_v11  ;;  %p581_p5 = pnand %p580_p3, %p574_p0 }
  0x1c   : > { %v304_v21 = vrot.slane %v243_v12, %v303_v13  ;;  %v308_v22 = vrot.slane %v243_v12, %v307_v14  ;;  %v330_v25 = vrot.slane %v243_v12, %v329_v15  ;;  %v334_v26 = vrot.slane %v243_v12, %v333_v16 }
  0x1d   : > { %v264_v27 = vrot.slane %v254_v17, %v253_v8  ;;  %v268_v28 = vrot.slane %v258_v18, %v253_v8  ;;  %v288_v29 = vrot.slane %v278_v19, %v277_v10  ;;  %v292_v30 = vrot.slane %v282_v20, %v277_v10 }
  0x1e   : > { %v314_v31 = vrot.slane %v304_v21, %v303_v13  ;;  %v318_v32 = vrot.slane %v308_v22, %v303_v13  ;;  %v340_v33 = vrot.slane %v330_v25, %v329_v15  ;;  %v344_v34 = vrot.slane %v334_v26, %v329_v15 }
  0x8f   : > { %v248_v23 = vpop.permute.xlu0 %247  ;;  %v299_v24 = vpop.permute.xlu1 %298 }
  0x90   : > { %v269_v37 = vmul.f32 %v264_v27, %v248_v23  ;;  %v270_v38 = vmul.f32 %v268_v28, %v248_v23  ;;  %v319_v41 = vmul.f32 %v314_v31, %v299_v24  ;;  %v320_v42 = vmul.f32 %v318_v32, %v299_v24 }
  0x94   : > { %v273_v35 = vpop.permute.xlu0 %272  ;;  %v325_v36 = vpop.permute.xlu1 %324 }
  0x95   : > { %v293_v39 = vmul.f32 %v288_v29, %v273_v35  ;;  %v294_v40 = vmul.f32 %v292_v30, %v273_v35  ;;  %v345_v45 = vmul.f32 %v340_v33, %v325_v36  ;;  %v346_v46 = vmul.f32 %v344_v34, %v325_v36 }
  0x97   : > { %v295_v43 = vadd.f32 %v293_v39, %v269_v37  ;;  %v296_v44 = vadd.f32 %v294_v40, %v270_v38 }
  0x99   : > { %v321_v47 = vadd.f32 %v319_v41, %v295_v43  ;;  %v322_v48 = vadd.f32 %v320_v42, %v296_v44  ;;  %v353_v49 = vpop.permute.xlu1 %352 }
  0x9b   : > { %v347_v50 = vadd.f32 %v345_v45, %v321_v47  ;;  %v348_v51 = vadd.f32 %v346_v46, %v322_v48 }
  0x9d   : > { %v355_v52 = vadd.f32 %v353_v49, %v347_v50  ;;  %v356_v53 = vadd.f32 %v353_v49, %v348_v51 }
  0x9f   : > { %357 = vst [vmem:[%s223_s11] sm:$0xff] %v355_v52  ;;  %358 = vst [vmem:[%s223_s11 + $0x8] sm:$0xff] %v356_v53 }
  0xa0   : > { %584 = shalt.err (!%p581_p5)
}
  0xa1   : > { %s585_s30 = scalar_lea.hbm %s749_s23, 256  ;;  %s589_s6 = scalar_lea.hbm %s801_s3, 512 }
  0xa2   : > { %p586_p6 = scmp.ne.s32.totalorder %s749_s23, %s585_s30  ;;  %p590_p10 = scmp.lt.u32.totalorder %s749_s23, %s801_s3 }
  0xa3   : > { %p591_p11 = scmp.lt.u32.totalorder %s589_s6, %s585_s30  ;;  %p593_p13 = scmp.lt.u32.totalorder %s585_s30, %s749_s23 }
  0xa4   : > { %p587_p7 = pnand %p586_p6, %p716_p4 }
  0xa5   : > { %p592_p12 = por %p591_p11, %p590_p10 }
  0xa6   : > { %p588_p9 = pneg %p587_p7 }
  0xa7   : > { %p594_p0 = por %p593_p13, %p592_p12 }
  0xa9   : > { %p595_p1 = pnand %p594_p0, %p588_p9 }
  0xab   : > { %598 = shalt.err (!%p595_p1)
}
  0xac   : > { %506 = dma.vmem_to_hbm [thread:$0]  (%p716_p4), %s751_s18, 256, %s749_s23, %s360_s15  }
  0xad PF: > { %p512_p2 = scmp.ge.s32.totalorder %s649_s17, 2  ;;  %s390_s9 = sand.u32 1, %s629_s12  }
  0xae   : > { %s391_s10 = scalar_lea.sflag [#allocation3], %s390_s9 }
  0xaf   : > { %p509_p3 = pnand %p512_p2, %p723_p8 }
  0xb1   : > { %624 = dma.done.wait (!%p509_p3), %s391_s10, 256  }
  0xb2   : > { %626 = vsyncadd (!%p509_p3), %s391_s10, 4294967040  ;;  %s16_s17 = sadd.s32 1, %s649_s17   ;;  %s804_s12 = smov %s633_s13 }
  0xb3   : > { %p13_p5 = scmp.ge.s32.totalorder %s16_s17, 4   ;;  %s805_s13 = smov %s637_s14 }
  0xb4   : > { %s806_s14 = smov %s729_s25  ;;  %s807_s15 = smov %s645_s16 }
  0xb5   : > { %s808_s16 = smov %s810_s20  ;;  %15 = sbr.rel (!%p13_p5) target bundleno = 4 (0x4), region = 73 }
  0xbc   :  { %396 = vsyncpa [#allocation3], 1 }
  0xbd   :  { %398 = vsyncpa [#allocation3 + $0x1], 1 }

</bundles_post_ra>
